<compile_context>
chip_gen: v7x
topology: tpu7x:2x2x1
jax: 0.10.0
libtpu: 0.0.40
codegen_flags: <defaults>
</compile_context>

<pallas_src>
import jax
import jax.numpy as jnp
from jax.experimental import pallas as pl
from jax.experimental.pallas import tpu as pltpu


def _round_up(x, m):
    return ((x + m - 1) // m) * m


def _flow_synth_kernel(h_ref, wh_ref, eb_ref, o_ref):
    # h_ref: (tile_t, df) f32   wh_ref: (df, mel) bf16
    # eb_ref: (1, mel) f32      o_ref: (tile_t, mel) f32
    h = h_ref[...].astype(jnp.bfloat16)  # in-kernel cast (VPU), hidden under DMA
    acc = jnp.dot(h, wh_ref[...], preferred_element_type=jnp.float32)
    o_ref[...] = (acc + eb_ref[...]).astype(o_ref.dtype)


def flow_synth(H, e, W, bias, *, tile_t=1024):
    """FlowSynth forward.

    H: (B, T, df) f32, e: (B, ds) f32,
    W: (mel, df+ds) f32 (nn.Linear weight), bias: (mel,) f32.
    Returns (B, T, mel) f32.
    """
    B, T, df = H.shape
    ds = e.shape[1]
    mel = W.shape[0]
    assert W.shape[1] == df + ds

    Wh = W[:, :df].T  # (df, mel)
    We = W[:, df:].T  # (ds, mel)

    # Tiny (B, ds) @ (ds, mel) + bias done once in f32 outside the kernel.
    ebias = (e.astype(jnp.float32) @ We.astype(jnp.float32)
             + bias.astype(jnp.float32)).reshape(B, 1, mel)

    # Tile T; 8-aligned because H stays f32 in VMEM ((8,128) tiling).
    tile = min(tile_t, _round_up(T, 8))
    T_pad = _round_up(T, tile)
    H_in = H if T_pad == T else jnp.pad(H, ((0, 0), (0, T_pad - T), (0, 0)))
    grid_t = T_pad // tile

    cost = pl.CostEstimate(
        flops=2 * B * T_pad * df * mel,
        transcendentals=0,
        bytes_accessed=(B * T_pad * df * 4      # H (f32 in)
                        + df * mel * 2          # Wh (bf16)
                        + B * mel * 4           # ebias
                        + B * T_pad * mel * 4),  # out
    )

    out = pl.pallas_call(
        _flow_synth_kernel,
        out_shape=jax.ShapeDtypeStruct((B, T_pad, mel), jnp.float32),
        grid_spec=pltpu.PrefetchScalarGridSpec(
            num_scalar_prefetch=0,
            grid=(B, grid_t),
            in_specs=[
                # H rows tile: (tile, df), batch dim squeezed out of the kernel ref.
                pl.BlockSpec((None, tile, df), lambda b, t: (b, t, 0)),
                # Wh: whole weight, VMEM-resident across the grid.
                pl.BlockSpec((df, mel), lambda b, t: (0, 0)),
                # per-batch ebias row, broadcast inside the kernel.
                pl.BlockSpec((None, 1, mel), lambda b, t: (b, 0, 0)),
            ],
            out_specs=pl.BlockSpec((None, tile, mel), lambda b, t: (b, t, 0)),
        ),
        compiler_params=pltpu.CompilerParams(
            dimension_semantics=("parallel", "parallel"),
            vmem_limit_bytes=32 * 1024 * 1024,  # fits v5e/v6e and v7x's 64 MiB VMEM
        ),
        cost_estimate=cost,
    )(H_in, Wh.astype(jnp.bfloat16), ebias)

    if T_pad > T:
        out = out[:, :T, :]
    return out.astype(H.dtype)


if __name__ == "__main__":
    # Small, deterministic shapes consistent with the module defaults.
    B, T = 2, 8
    df, ds, mel = 512, 64, 80

    key = jax.random.PRNGKey(0)
    k_h, k_e, k_w, k_b = jax.random.split(key, 4)

    H = jax.random.normal(k_h, (B, T, df), dtype=jnp.float32)
    e = jax.random.normal(k_e, (B, ds), dtype=jnp.float32)

    # nn.Linear(df+ds, mel): weight (mel, df+ds), bias (mel,), uniform(+-1/sqrt(fan_in)).
    fan_in = df + ds
    bound = 1.0 / jnp.sqrt(fan_in)
    W = jax.random.uniform(k_w, (mel, fan_in), minval=-bound, maxval=bound, dtype=jnp.float32)
    bias = jax.random.uniform(k_b, (mel,), minval=-bound, maxval=bound, dtype=jnp.float32)

    out = flow_synth(H, e, W, bias)
    out = jax.block_until_ready(out)

    # Reference (plain JAX f32, same math as the PyTorch forward).
    e_exp = jnp.broadcast_to(e[:, None, :], (B, T, ds))
    ref = jnp.concatenate([H, e_exp], axis=-1) @ W.T + bias

    assert out.shape == (B, T, mel)
    # bf16 MXU inputs (H, Wh) with f32 accumulate: tolerance covers bf16 rounding.
    assert jnp.allclose(out, ref, atol=2e-2, rtol=2e-2), float(jnp.max(jnp.abs(out - ref)))

    print("KERNEL_OK")
</pallas_src>

<mosaic_0001>
module attributes {stable_mosaic.version = 11 : i64} {
  func.func @_flow_synth_kernel(%arg0: i32, %arg1: i32, %arg2: memref<1x8x512xf32, #tpu.memory_space<vmem>>, %arg3: memref<512x80xbf16, #tpu.memory_space<vmem>>, %arg4: memref<1x1x80xf32, #tpu.memory_space<vmem>>, %arg5: memref<1x8x80xf32, #tpu.memory_space<vmem>>) attributes {dimension_semantics = [#tpu.dimension_semantics<parallel>, #tpu.dimension_semantics<parallel>], iteration_bounds = array<i64: 2, 1>, scalar_prefetch = 0 : i64, scratch_operands = 0 : i64, tpu.core_type = #tpu.core_type<tc>, window_params = [{transform_indices = @transform_0, window_bounds = array<i64: 1, 8, 512>}, {pipeline_mode = #tpu.pipeline_mode<synchronous>, transform_indices = @transform_1, window_bounds = array<i64: 512, 80>}, {transform_indices = @transform_2, window_bounds = array<i64: 1, 1, 80>}, {transform_indices = @transform_3, window_bounds = array<i64: 1, 8, 80>}]} {
    %c0 = arith.constant 0 : index
    %c0_0 = arith.constant 0 : index
    %c0_1 = arith.constant 0 : index
    %0 = vector.load %arg2[%c0, %c0_0, %c0_1] : memref<1x8x512xf32, #tpu.memory_space<vmem>>, vector<1x8x512xf32>
    %1 = vector.shape_cast %0 : vector<1x8x512xf32> to vector<8x512xf32>
    %2 = arith.truncf %1 : vector<8x512xf32> to vector<8x512xbf16>
    %c0_2 = arith.constant 0 : index
    %c0_3 = arith.constant 0 : index
    %3 = vector.load %arg3[%c0_2, %c0_3] : memref<512x80xbf16, #tpu.memory_space<vmem>>, vector<512x80xbf16>
    %cst = arith.constant dense<0.000000e+00> : vector<8x80xf32>
    %4 = tpu.matmul %2, %3, %cst {dimension_numbers = #tpu.dot_dimension_numbers<[1], [0], [0], [1], [0, 0, 1, 1], [], []>} : vector<8x512xbf16>, vector<512x80xbf16>, vector<8x80xf32> -> vector<8x80xf32>
    %c0_4 = arith.constant 0 : index
    %c0_5 = arith.constant 0 : index
    %c0_6 = arith.constant 0 : index
    %5 = vector.load %arg4[%c0_4, %c0_5, %c0_6] : memref<1x1x80xf32, #tpu.memory_space<vmem>>, vector<1x1x80xf32>
    %6 = vector.shape_cast %5 : vector<1x1x80xf32> to vector<1x80xf32>
    %7 = vector.broadcast %6 : vector<1x80xf32> to vector<8x80xf32>
    %8 = arith.addf %4, %7 : vector<8x80xf32>
    %c0_7 = arith.constant 0 : index
    %c0_8 = arith.constant 0 : index
    %c0_9 = arith.constant 0 : index
    %9 = vector.load %arg5[%c0_7, %c0_8, %c0_9] : memref<1x8x80xf32, #tpu.memory_space<vmem>>, vector<1x8x80xf32>
    %10 = vector.shape_cast %9 : vector<1x8x80xf32> to vector<8x80xf32>
    %11 = vector.shape_cast %8 : vector<8x80xf32> to vector<1x8x80xf32>
    tpu.vector_store %arg5[%c0_7, %c0_8, %c0_9], %11 {strides = array<i32>} : memref<1x8x80xf32, #tpu.memory_space<vmem>>, vector<1x8x80xf32>,
    return
  }
  func.func @transform_0(%arg0: i32, %arg1: i32) -> (i32, i32, i32) {
    %c0_i32 = arith.constant 0 : i32
    %c0_i32_0 = arith.constant 0 : i32
    return %arg0, %arg1, %c0_i32 : i32, i32, i32
  }
  func.func @transform_1(%arg0: i32, %arg1: i32) -> (i32, i32) {
    %c0_i32 = arith.constant 0 : i32
    %c0_i32_0 = arith.constant 0 : i32
    %c0_i32_1 = arith.constant 0 : i32
    return %c0_i32, %c0_i32_0 : i32, i32
  }
  func.func @transform_2(%arg0: i32, %arg1: i32) -> (i32, i32, i32) {
    %c0_i32 = arith.constant 0 : i32
    %c0_i32_0 = arith.constant 0 : i32
    %c0_i32_1 = arith.constant 0 : i32
    return %arg0, %c0_i32, %c0_i32_0 : i32, i32, i32
  }
  func.func @transform_3(%arg0: i32, %arg1: i32) -> (i32, i32, i32) {
    %c0_i32 = arith.constant 0 : i32
    %c0_i32_0 = arith.constant 0 : i32
    return %arg0, %arg1, %c0_i32 : i32, i32, i32
  }
}

</mosaic_0001>

<bundles_post_ra>
// kernel: tpu_custom_call.1
= control target key start
LH: loop header
LB: loop body
LE: loop exit
PB: predicated region body
PF: predicated region fallthrough
CT: control target
= control target key end

     0   :  { %8 = vsyncpa [#allocation3], 0  ;;  %s1159_s0 = inlined_call_operand.vmem [shape: f32[2,8,512], index: 0, kind: input, shape index: {}]   ;;  %s1160_s1 = inlined_call_operand.vmem [shape: bf16[512,80], index: 1, kind: input, shape index: {}]   ;;  %s1161_s2 = inlined_call_operand.vmem [shape: f32[2,1,80], index: 2, kind: input, shape index: {}]   ;;  %s1162_s3 = inlined_call_operand.hbm [shape: f32[2,8,80], index: 3, kind: output, shape index: {}]  }
   0x1   :  { %10 = vsyncpa [#allocation3 + $0x1], 0  ;;  %s944_s12 = smov 0   ;;  %s946_s13 = smov 0  }
   0x2   :  { %s948_s14 = smov 0   ;;  %s950_s15 = smov 0  }
   0x3   :  { %s952_s16 = smov 0   ;;  %s954_s17 = smov 0  }
   0x4 LB: > { %s666_s18 = sadd.s32 4294967295, %s921_s17   ;;  %s667_s19 = sadd.s32 4294967294, %s921_s17   ;;  %s921_s17 = sphi %s954_s17, %s16_s17   ;;  %s917_s16 = sphi %s952_s16, %s1169_s16   ;;  %s913_s15 = sphi %s950_s15, %s1168_s15   ;;  %s909_s14 = sphi %s948_s14, %s1167_s14   ;;  %s905_s13 = sphi %s946_s13, %s1166_s13   ;;  %s901_s12 = sphi %s944_s12, %s1165_s12  }
   0x5   : > { %s28_s20 = sadd.s32 1, %s917_s16  ;;  %s112_s21 = sadd.s32 1, %s909_s14 }
   0x6   : > { %p30_p0 = scmp.ge.s32.totalorder %s28_s20, 2  ;;  %p122_p1 = scmp.ne.s32.totalorder %s909_s14, %s905_s13 }
   0x7   : > { %p123_p2 = scmp.eq.s32.totalorder %s666_s18, 1  ;;  %p128_p3 = scmp.ne.s32.totalorder %s905_s13, %s901_s12 }
   0x8   : > { %s1171_s20 = smov (%p30_p0, %s28_s20), 0  ;;  %p129_p5 = scmp.eq.s32.totalorder %s667_s19, 1 }
   0x9   : > { %p984_p4 = por %p123_p2, %p122_p1  ;;  %s107_s23 = ssub.s32 %s917_s16, %s1171_s20 }
   0xa   : > { %p670_p6 = scmp.ge.s32.totalorder %s921_s17, 1  ;;  %p110_p7 = scmp.eq.s32.totalorder %s107_s23, 0 }
   0xb   : > { %p991_p8 = por %p129_p5, %p128_p3  ;;  %p168_p9 = scmp.lt.s32.totalorder %s921_s17, 3 }
   0xc   : > { %s997_s25 = scalar_select %p110_p7, %s909_s14, %s112_s21  }
   0xd   : > { %p169_p10 = pnand %p670_p6, %p168_p9 }
   0xe   : > { %v811_v0 = vld [vmem:[%s1160_s1 + $0x40] sm:$0xff] (!%p169_p10)   ;;  %v815_v4 = vld [vmem:[%s1160_s1 + $0x48] sm:$0xff] (!%p169_p10)   ;;  %v819_v8 = vld [vmem:[%s1160_s1 + $0x50] sm:$0xff] (!%p169_p10)   ;;  %p199_p11 = scmp.lt.s32.totalorder (!%p169_p10), %s913_s15, 1  ;;  %s196_s28 = sand.u32 (!%p169_p10), 1, %s905_s13   ;;  %vm563_vm0 = vcmask (!%p169_p10), 654336  }
   0xf   : > { %172 = sbr.rel (%p169_p10) target bundleno = 281 (0x119), region = 32  ;;  %v812_v1 = vld [vmem:[%s1160_s1 + $0xc0] sm:$0xff] (!%p169_p10)   ;;  %712 = vmatprep.subr.bf16.mxu0 (!%p169_p10), %v811_v0  ;;  %v816_v5 = vld [vmem:[%s1160_s1 + $0xc8] sm:$0xff] (!%p169_p10)   ;;  %v820_v9 = vld [vmem:[%s1160_s1 + $0xd0] sm:$0xff] (!%p169_p10)   ;;  %s671_s29 = sshll.u32 (!%p169_p10), %s196_s28, 3 }
  0x10   : > { %v813_v2 = vld [vmem:[%s1160_s1] sm:$0xff] (!%p169_p10)   ;;  %734 = vmatprep.subr.bf16.mxu1 (!%p169_p10), %v812_v1  ;;  %v817_v6 = vld [vmem:[%s1160_s1 + $0x8] sm:$0xff] (!%p169_p10)   ;;  %v821_v10 = vld [vmem:[%s1160_s1 + $0x10] sm:$0xff] (!%p169_p10)   ;;  %s708_s6 = sshll.u32 (!%p169_p10), %s913_s15, 7  ;;  %s198_s7 = scalar_lea.vmem (!%p169_p10), [#allocation2], %s671_s29 }
  0x11   : > { %v814_v3 = vld [vmem:[%s1160_s1 + $0x80] sm:$0xff] (!%p169_p10)   ;;  %713 = vmatpush3.bf16.msra.mxu0 (!%p169_p10), %v813_v2  ;;  %v818_v7 = vld [vmem:[%s1160_s1 + $0x88] sm:$0xff] (!%p169_p10)   ;;  %v822_v11 = vld [vmem:[%s1160_s1 + $0x90] sm:$0xff] (!%p169_p10)   ;;  %s580_s8 = sshll.u32 (!%p169_p10), %s198_s7, 4  ;;  %s1112_s10 = scalar_lea.hbm (!%p169_p10), %s1162_s3, %s708_s6  ;;  %s1114_s8 = int_to_ptr.vmem [resolvable:$true] %s580_s8 }
  0x12   : > { %735 = vmatpush3.bf16.msra.mxu1 (!%p169_p10), %v814_v3  ;;  %714 = vmatprep.subr.bf16.mxu0 (!%p169_p10), %v815_v4  ;;  %v823_v12 = vld [vmem:[%s1160_s1 + $0x58] sm:$0xff] (!%p169_p10)   ;;  %v827_v16 = vld [vmem:[%s1160_s1 + $0x60] sm:$0xff] (!%p169_p10)   ;;  %v831_v20 = vld [vmem:[%s1160_s1 + $0x68] sm:$0xff] (!%p169_p10)   ;;  %s566_s18 = scalar_lea.sflag (!%p169_p10), [#allocation3], %s196_s28 }
  0x13   : > { %736 = vmatprep.subr.bf16.mxu1 (!%p169_p10), %v816_v5  ;;  %v824_v13 = vld [vmem:[%s1160_s1 + $0xd8] sm:$0xff] (!%p169_p10)   ;;  %v828_v17 = vld [vmem:[%s1160_s1 + $0xe0] sm:$0xff] (!%p169_p10)   ;;  %v832_v21 = vld [vmem:[%s1160_s1 + $0xe8] sm:$0xff] (!%p169_p10)  }
  0x14   : > { %v825_v14 = vld [vmem:[%s1160_s1 + $0x18] sm:$0xff] (!%p169_p10)   ;;  %v829_v18 = vld [vmem:[%s1160_s1 + $0x20] sm:$0xff] (!%p169_p10)   ;;  %v833_v22 = vld [vmem:[%s1160_s1 + $0x28] sm:$0xff] (!%p169_p10)  }
  0x15   : > { %715 = vmatpush3.bf16.msra.mxu0 (!%p169_p10), %v817_v6  ;;  %v826_v15 = vld [vmem:[%s1160_s1 + $0x98] sm:$0xff] (!%p169_p10)   ;;  %v830_v19 = vld [vmem:[%s1160_s1 + $0xa0] sm:$0xff] (!%p169_p10)   ;;  %v834_v23 = vld [vmem:[%s1160_s1 + $0xa8] sm:$0xff] (!%p169_p10)  }
  0x16   : > { %737 = vmatpush3.bf16.msra.mxu1 %v818_v7  ;;  %716 = vmatprep.subr.bf16.mxu0 %v819_v8  ;;  %s1070_s11 = scalar_select %p199_p11, %s913_s15, 1  ;;  %v835_v24 = vld [vmem:[%s1160_s1 + $0x70] sm:$0xff]   ;;  %v839_v28 = vld [vmem:[%s1160_s1 + $0x78] sm:$0xff]  }
  0x17   : > { %738 = vmatprep.subr.bf16.mxu1 %v820_v9  ;;  %v836_v25 = vld [vmem:[%s1160_s1 + $0xf0] sm:$0xff]   ;;  %v840_v29 = vld [vmem:[%s1160_s1 + $0xf8] sm:$0xff]   ;;  %s923_s15 = smov [#allocation2]  }
  0x18   : > { %v837_v26 = vld [vmem:[%s1160_s1 + $0x30] sm:$0xff]   ;;  %s711_s30 = sshll.u32 %s1070_s11, 5  ;;  %v841_v30 = vld [vmem:[%s1160_s1 + $0x38] sm:$0xff]   ;;  %s210_s5 = scalar_lea.vmem %s1161_s2, %s1070_s11 }
  0x19   : > { %717 = vmatpush3.bf16.msra.mxu0 %v821_v10  ;;  %v838_v27 = vld [vmem:[%s1160_s1 + $0xb0] sm:$0xff]   ;;  %s207_s19 = scalar_lea.vmem %s1159_s0, %s711_s30  ;;  %v842_v31 = vld [vmem:[%s1160_s1 + $0xb8] sm:$0xff]   ;;  %v674_v42 = vld [vmem:[%s210_s5] ss:$0 sm:$0xff]  ;;  %s847_s21 = sshll.u32 %s923_s15, 4  ;;  %s848_s21 = int_to_ptr.vmem [resolvable:$false] %s847_s21 }
  0x1a   : > { %739 = vmatpush3.bf16.msra.mxu1 %v822_v11  ;;  %718 = vmatprep.subr.bf16.mxu0 %v823_v12  ;;  %v213_v32 = vld [vmem:[%s207_s19 + $0x8] sm:$0xff]  ;;  %v215_v33 = vld [vmem:[%s207_s19 + $0x18] sm:$0xff]  ;;  %v212_v34 = vld [vmem:[%s207_s19] sm:$0xff]  ;;  %s849_s23 = scalar_lea.vmem %s848_s21, 256  ;;  %p850_p1 = scmp.lt.s32.totalorder %s1114_s8, %s848_s21 }
  0x1b   : > { %740 = vmatprep.subr.bf16.mxu1 %v824_v13  ;;  %v217_v35 = vpack.c.bf16 %v213_v32, %v213_v32  ;;  %v219_v36 = vpack.c.bf16 %v215_v33, %v215_v33  ;;  %v216_v37 = vpack.c.bf16 %v212_v34, %v212_v34  ;;  %v214_v38 = vld [vmem:[%s207_s19 + $0x10] sm:$0xff]  ;;  %s843_s19 = scalar_lea.vmem %s1114_s8, 128 }
  0x1c   : > { %v218_v39 = vpack.c.bf16 %v214_v38, %v214_v38  ;;  %p844_p12 = scmp.ne.s32.totalorder %s1114_s8, %s843_s19  ;;  %p851_p2 = scmp.lt.s32.totalorder %s849_s23, %s843_s19 }
  0x1d   : > { %719 = vmatpush3.bf16.msra.mxu0 %v825_v14  ;;  %515 = vmatprep.mubr.bf16.mxu0 %v217_v35 }
  0x1e   : > { %741 = vmatpush3.bf16.msra.mxu1 %v826_v15  ;;  %720 = vmatprep.subr.bf16.mxu0 %v827_v16  ;;  %p845_p13 = pnand %p844_p12, %p984_p4  ;;  %p852_p3 = por %p851_p2, %p850_p1 }
  0x1f   : > { %742 = vmatprep.subr.bf16.mxu1 %v828_v17  ;;  %555 = vmatprep.mubr.bf16.mxu1 %v219_v36 }
  0x20   : > { %p846_p0 = pneg %p845_p13 }
  0x21   : > { %721 = vmatpush3.bf16.msra.mxu0 %v829_v18 }
  0x22   : > { %743 = vmatpush3.bf16.msra.mxu1 %v830_v19  ;;  %722 = vmatprep.subr.bf16.mxu0 %v831_v20  ;;  %p853_p5 = pnand %p852_p3, %p846_p0 }
  0x23   : > { %744 = vmatprep.subr.bf16.mxu1 %v832_v21 }
  0x25   : > { %723 = vmatpush3.bf16.msra.mxu0 %v833_v22 }
  0x26   : > { %745 = vmatpush3.bf16.msra.mxu1 %v834_v23  ;;  %724 = vmatprep.subr.bf16.mxu0 %v835_v24 }
  0x27   : > { %746 = vmatprep.subr.bf16.mxu1 %v836_v25 }
  0x29   : > { %725 = vmatpush3.bf16.msra.mxu0 %v837_v26 }
  0x2a   : > { %747 = vmatpush3.bf16.msra.mxu1 %v838_v27  ;;  %726 = vmatprep.subr.bf16.mxu0 %v839_v28 }
  0x2b   : > { %748 = vmatprep.subr.bf16.mxu1 %v840_v29 }
  0x2d   : > { %727 = vmatpush3.bf16.msra.mxu0 %v841_v30 }
  0x2e   : > { %749 = vmatpush3.bf16.msra.mxu1 %v842_v31 }
  0x30   : > { %516 = vmatmul.mubr.bf16.vlgmr.msra.gmra.mrb[0].mxu0 %v216_v37 }
  0x31   : > { %556 = vmatmul.mubr.bf16.vlgmr.msra.gmra.mrb[0].mxu1 %v218_v39 }
 0x103   : > { %v728_v40 = vpop.f32.mrb[0].mxu0 }
 0x104   : > { %v750_v41 = vpop.f32.mrb[0].mxu1  ;;  %v729_v43 = vpop.f32.mrb[1].mxu0 }
 0x105   : > { %v751_v44 = vpop.f32.mrb[1].mxu1  ;;  %v730_v45 = vadd.f32 %v729_v43, %v728_v40  ;;  %v731_v47 = vpop.f32.mrb[2].mxu0 }
 0x106   : > { %v752_v46 = vadd.f32 %v751_v44, %v750_v41  ;;  %v753_v48 = vpop.f32.mrb[2].mxu1  ;;  %v732_v49 = vpop.f32.mrb[3].mxu0 }
 0x107   : > { %v754_v50 = vpop.f32.mrb[3].mxu1  ;;  %v518_v51 = vadd.f32 %v730_v45, %v674_v42 }
 0x109   : > { %v558_v52 = vadd.f32 %v752_v46, %v518_v51 }
 0x10b   : > { %564 = vst.msk [vmem:[%s198_s7] sm:$0xff] %vm563_vm0, %v558_v52 }
 0x10c   : > { %856 = shalt.err (!%p853_p5)
}
 0x10d   : > { %s857_s26 = scalar_lea.hbm %s1112_s10, 128  ;;  %s861_s29 = scalar_lea.hbm %s1162_s3, 256 }
 0x10e   : > { %p858_p6 = scmp.ne.s32.totalorder %s1112_s10, %s857_s26  ;;  %p862_p10 = scmp.lt.u32.totalorder %s1112_s10, %s1162_s3 }
 0x10f   : > { %p863_p11 = scmp.lt.u32.totalorder %s861_s29, %s857_s26  ;;  %p865_p13 = scmp.lt.u32.totalorder %s857_s26, %s1112_s10 }
 0x110   : > { %p859_p7 = pnand %p858_p6, %p984_p4 }
 0x111   : > { %p864_p12 = por %p863_p11, %p862_p10 }
 0x112   : > { %p860_p9 = pneg %p859_p7 }
 0x113   : > { %p866_p0 = por %p865_p13, %p864_p12 }
 0x115   : > { %p867_p1 = pnand %p866_p0, %p860_p9 }
 0x117   : > { %870 = shalt.err (!%p867_p1)
}
 0x118   : > { %756 = dma.vmem_to_hbm [thread:$0]  (%p984_p4), %s1114_s8, 128, %s1112_s10, %s566_s18  }
 0x119 PF: > { %p762_p2 = scmp.ge.s32.totalorder %s921_s17, 2  ;;  %s592_s5 = sand.u32 1, %s901_s12  }
 0x11a   : > { %s593_s6 = scalar_lea.sflag [#allocation3], %s592_s5 }
 0x11b   : > { %p759_p3 = pnand %p762_p2, %p991_p8 }
 0x11d   : > { %896 = dma.done.wait (!%p759_p3), %s593_s6, 128  }
 0x11e   : > { %898 = vsyncadd (!%p759_p3), %s593_s6, 4294967168  ;;  %s16_s17 = sadd.s32 1, %s921_s17   ;;  %s1165_s12 = smov %s905_s13 }
 0x11f   : > { %p13_p5 = scmp.ge.s32.totalorder %s16_s17, 4   ;;  %s1166_s13 = smov %s909_s14 }
 0x120   : > { %s1167_s14 = smov %s997_s25  ;;  %s1168_s15 = smov %s917_s16 }
 0x121   : > { %s1169_s16 = smov %s1171_s20  ;;  %15 = sbr.rel (!%p13_p5) target bundleno = 4 (0x4), region = 70 }
 0x128   :  { %598 = vsyncpa [#allocation3], 1 }
 0x129   :  { %600 = vsyncpa [#allocation3 + $0x1], 1 }

</bundles_post_ra>
